<compile_context>
chip_gen: v7x
topology: tpu7x:2x2x1
jax: 0.10.0
libtpu: 0.0.40
codegen_flags: <defaults>
</compile_context>

<pallas_src>
import jax
import jax.numpy as jnp
from jax import lax
from jax.experimental import pallas as pl
from jax.experimental.pallas import tpu as pltpu

NEG_SLOPE = 0.01  # F.leaky_relu default negative_slope


def _leaky_relu(x):
    return jnp.where(x >= 0, x, NEG_SLOPE * x)


def _softplus(x):
    # matches torch.nn.functional.softplus (beta=1, threshold=20)
    return jnp.where(x > 20.0, x, jnp.log1p(jnp.exp(jnp.minimum(x, 20.0))))


def _make_kernel(n_layers, tb, b_total):
    """Kernel ref order: x_ref (TB, F), (W_0, b_0), ..., (W_{L-1}, b_{L-1}), out_ref (1, TB).

    Layer 0: lax.dot_general contracts the feature axis of W (out0, F) with the feature
    (lane) axis of the x tile (TB, F) -> (out0, TB); batch lands on the lane axis.
    Remaining layers: h <- leaky_relu(W @ h + b) with W in PyTorch (out, in) layout and
    (out, 1) biases broadcasting over lanes.  Head: softplus.  Padded batch columns of a
    partial last block are zeroed before the store.
    """

    def kernel(x_ref, *refs):
        out_ref = refs[-1]
        prm = refs[:-1]
        x = x_ref[...]  # (TB, F) f32, batch on sublanes
        z = None
        h = None
        for i in range(n_layers):
            W = prm[2 * i][...]          # (out_i, in_i)
            b = prm[2 * i + 1][...]      # (out_i, 1)
            if i == 0:
                # (out0, F) . (TB, F)^T -> (out0, TB): MXU-native A @ B^T contraction.
                z = lax.dot_general(W, x, (((1,), (1,)), ((), ())),
                                    preferred_element_type=jnp.float32) + b
            else:
                z = jnp.dot(W, h, preferred_element_type=jnp.float32) + b
            if i < n_layers - 1:
                h = _leaky_relu(z)
        out = _softplus(z)  # (1, TB)
        # Zero out-of-range batch columns of the (possibly partial) last block.  They are
        # discarded by Pallas' masked store anyway; this just keeps them NaN-free.
        col = pl.program_id(0) * tb + lax.broadcasted_iota(jnp.int32, out.shape, 1)
        out_ref[...] = jnp.where(col < b_total, out, 0.0)

    return kernel


def _round_up(n, m):
    return ((n + m - 1) // m) * m


def dnn_forward(x, params, *, batch_tile=8192):
    """Pallas forward of DNN.

    x: (B, input_dim); params: list of (W, b) with W shaped (out_features, in_features)
    and b shaped (out_features,), exactly like the PyTorch module's nn.Linear layers.
    Returns (B, 1).
    """
    n_layers = len(params)
    B, F = x.shape
    x = x.astype(jnp.float32)

    # Batch tile becomes the lane axis of activations/output -> multiple of 128.
    # Large enough to amortize per-grid-step overhead, capped for VMEM headroom.
    batch_tile = max(128, min(_round_up(batch_tile, 128), 16384))
    TB = min(batch_tile, _round_up(B, 128))
    # Keep >= 2 grid steps when the batch allows it, so the "parallel" batch axis can be
    # sharded across v7x's two TensorCores (harmless on single-TC v5e/v6e).
    if B > 128 and pl.cdiv(B, TB) < 2:
        TB = max(128, _round_up(pl.cdiv(B, 2), 128))
    grid = (pl.cdiv(B, TB),)

    flat = [x]
    # Native (B, F) layout: block spans the full row width -> contiguous HBM region.
    in_specs = [pl.BlockSpec((TB, F), lambda i: (i, 0))]
    for W, b in params:
        Wf = W.astype(jnp.float32)                  # (out, in), used directly (no transpose)
        bf = b.reshape(-1, 1).astype(jnp.float32)   # (out, 1), broadcasts over lanes (batch)
        flat += [Wf, bf]
        in_specs += [
            pl.BlockSpec(Wf.shape, lambda i: (0, 0)),  # constant index_map -> VMEM-resident
            pl.BlockSpec(bf.shape, lambda i: (0, 0)),
        ]

    out = pl.pallas_call(
        _make_kernel(n_layers, TB, B),
        out_shape=jax.ShapeDtypeStruct((1, B), jnp.float32),
        grid=grid,
        in_specs=in_specs,
        out_specs=pl.BlockSpec((1, TB), lambda i: (0, i)),
        compiler_params=pltpu.CompilerParams(
            dimension_semantics=("parallel",),   # batch-parallel (v7x 2-TC sharding)
            vmem_limit_bytes=48 * 1024 * 1024,   # lane-padded x tile + double-buffering
        ),
    )(*flat)

    return out[0, :, None]  # (B, 1), no output transpose


def dnn_reference(x, params):
    """Plain-JAX reference mirroring the PyTorch DNN.forward exactly."""
    h = x
    for W, b in params[:-1]:
        h = _leaky_relu(h @ W.T + b)
    W, b = params[-1]
    return _softplus(h @ W.T + b)


def init_dnn_params(key, nb_layers, nb_units, input_dim):
    """Deterministic synthetic init matching DNN.__init__:
    xavier_normal_(gain=calculate_gain('leaky_relu')) weights, zero biases."""
    gain = (2.0 / (1.0 + NEG_SLOPE ** 2)) ** 0.5  # calculate_gain('leaky_relu')
    dim_list = [input_dim] + [nb_units] * nb_layers + [1]
    params = []
    for i in range(len(dim_list) - 1):
        key, wk = jax.random.split(key)
        fan_in, fan_out = dim_list[i], dim_list[i + 1]
        std = gain * (2.0 / (fan_in + fan_out)) ** 0.5
        W = std * jax.random.normal(wk, (fan_out, fan_in), dtype=jnp.float32)
        b = jnp.zeros((fan_out,), dtype=jnp.float32)
        params.append((W, b))
    return params


if __name__ == "__main__":
    key = jax.random.PRNGKey(0)

    # --- config 1: tiny batch (single partial 128-lane tile) ---
    nb_layers, nb_units, input_dim, batch = 2, 32, 6, 8
    key, pkey, xkey = jax.random.split(key, 3)
    params = init_dnn_params(pkey, nb_layers, nb_units, input_dim)
    x = jax.random.normal(xkey, (batch, input_dim), dtype=jnp.float32)

    out = jax.block_until_ready(dnn_forward(x, params))
    ref = dnn_reference(x, params)
    assert out.shape == (batch, 1)
    assert jnp.allclose(out, ref, atol=1e-5, rtol=1e-5)

    # --- config 2: batch not a tile multiple, 2 grid steps (partial last block + masking) ---
    key, pkey2, xkey2 = jax.random.split(key, 3)
    params2 = init_dnn_params(pkey2, 3, 32, 10)
    x2 = jax.random.normal(xkey2, (300, 10), dtype=jnp.float32)
    out2 = jax.block_until_ready(dnn_forward(x2, params2))
    ref2 = dnn_reference(x2, params2)
    assert out2.shape == (300, 1)
    assert jnp.allclose(out2, ref2, atol=1e-5, rtol=1e-5)

    # --- config 3: larger batch, exercises the >=2-step tile split + pipelining ---
    key, pkey3, xkey3 = jax.random.split(key, 3)
    params3 = init_dnn_params(pkey3, 2, 32, 6)
    x3 = jax.random.normal(xkey3, (2000, 6), dtype=jnp.float32)
    out3 = jax.block_until_ready(dnn_forward(x3, params3))
    ref3 = dnn_reference(x3, params3)
    assert out3.shape == (2000, 1)
    assert jnp.allclose(out3, ref3, atol=1e-5, rtol=1e-5)

    print("KERNEL_OK")
</pallas_src>

<mosaic_0001>
module attributes {stable_mosaic.version = 11 : i64} {
  func.func @kernel(%arg0: i32, %arg1: memref<128x6xf32, #tpu.memory_space<vmem>>, %arg2: memref<32x6xf32, #tpu.memory_space<vmem>>, %arg3: memref<32x1xf32, #tpu.memory_space<vmem>>, %arg4: memref<32x32xf32, #tpu.memory_space<vmem>>, %arg5: memref<32x1xf32, #tpu.memory_space<vmem>>, %arg6: memref<1x32xf32, #tpu.memory_space<vmem>>, %arg7: memref<1x1xf32, #tpu.memory_space<vmem>>, %arg8: memref<1x128xf32, #tpu.memory_space<vmem>>) attributes {dimension_semantics = [#tpu.dimension_semantics<parallel>], iteration_bounds = array<i64: 1>, scalar_prefetch = 0 : i64, scratch_operands = 0 : i64, tpu.core_type = #tpu.core_type<tc>, window_params = [{transform_indices = @transform_0, window_bounds = array<i64: 128, 6>}, {pipeline_mode = #tpu.pipeline_mode<synchronous>, transform_indices = @transform_1, window_bounds = array<i64: 32, 6>}, {pipeline_mode = #tpu.pipeline_mode<synchronous>, transform_indices = @transform_2, window_bounds = array<i64: 32, 1>}, {pipeline_mode = #tpu.pipeline_mode<synchronous>, transform_indices = @transform_3, window_bounds = array<i64: 32, 32>}, {pipeline_mode = #tpu.pipeline_mode<synchronous>, transform_indices = @transform_4, window_bounds = array<i64: 32, 1>}, {pipeline_mode = #tpu.pipeline_mode<synchronous>, transform_indices = @transform_5, window_bounds = array<i64: 1, 32>}, {pipeline_mode = #tpu.pipeline_mode<synchronous>, transform_indices = @transform_6, window_bounds = array<i64: 1, 1>}, {transform_indices = @transform_7, window_bounds = array<i64: 1, 128>}]} {
    %c0 = arith.constant 0 : index
    %c0_0 = arith.constant 0 : index
    %0 = vector.load %arg1[%c0, %c0_0] : memref<128x6xf32, #tpu.memory_space<vmem>>, vector<128x6xf32>
    %c0_1 = arith.constant 0 : index
    %c0_2 = arith.constant 0 : index
    %1 = vector.load %arg2[%c0_1, %c0_2] : memref<32x6xf32, #tpu.memory_space<vmem>>, vector<32x6xf32>
    %c0_3 = arith.constant 0 : index
    %c0_4 = arith.constant 0 : index
    %2 = vector.load %arg3[%c0_3, %c0_4] : memref<32x1xf32, #tpu.memory_space<vmem>>, vector<32x1xf32>
    %cst = arith.constant dense<0.000000e+00> : vector<32x128xf32>
    %3 = tpu.matmul %1, %0, %cst {dimension_numbers = #tpu.dot_dimension_numbers<[1], [1], [0], [0], [0, 0, 1, 0], [], []>} : vector<32x6xf32>, vector<128x6xf32>, vector<32x128xf32> -> vector<32x128xf32>
    %4 = vector.broadcast %2 : vector<32x1xf32> to vector<32x128xf32>
    %5 = arith.addf %3, %4 : vector<32x128xf32>
    %cst_5 = arith.constant 0.000000e+00 : f32
    %6 = vector.broadcast %cst_5 : f32 to vector<32x128xf32>
    %7 = arith.cmpf oge, %5, %6 : vector<32x128xf32>
    %cst_6 = arith.constant 0.00999999977 : f32
    %8 = vector.broadcast %cst_6 : f32 to vector<32x128xf32>
    %9 = arith.mulf %8, %5 : vector<32x128xf32>
    %10 = arith.select %7, %5, %9 : vector<32x128xi1>, vector<32x128xf32>
    %c0_7 = arith.constant 0 : index
    %c0_8 = arith.constant 0 : index
    %11 = vector.load %arg4[%c0_7, %c0_8] : memref<32x32xf32, #tpu.memory_space<vmem>>, vector<32x32xf32>
    %c0_9 = arith.constant 0 : index
    %c0_10 = arith.constant 0 : index
    %12 = vector.load %arg5[%c0_9, %c0_10] : memref<32x1xf32, #tpu.memory_space<vmem>>, vector<32x1xf32>
    %cst_11 = arith.constant dense<0.000000e+00> : vector<32x128xf32>
    %13 = tpu.matmul %11, %10, %cst_11 {dimension_numbers = #tpu.dot_dimension_numbers<[1], [0], [0], [1], [0, 0, 1, 1], [], []>} : vector<32x32xf32>, vector<32x128xf32>, vector<32x128xf32> -> vector<32x128xf32>
    %14 = vector.broadcast %12 : vector<32x1xf32> to vector<32x128xf32>
    %15 = arith.addf %13, %14 : vector<32x128xf32>
    %cst_12 = arith.constant 0.000000e+00 : f32
    %16 = vector.broadcast %cst_12 : f32 to vector<32x128xf32>
    %17 = arith.cmpf oge, %15, %16 : vector<32x128xf32>
    %cst_13 = arith.constant 0.00999999977 : f32
    %18 = vector.broadcast %cst_13 : f32 to vector<32x128xf32>
    %19 = arith.mulf %18, %15 : vector<32x128xf32>
    %20 = arith.select %17, %15, %19 : vector<32x128xi1>, vector<32x128xf32>
    %c0_14 = arith.constant 0 : index
    %c0_15 = arith.constant 0 : index
    %21 = vector.load %arg6[%c0_14, %c0_15] : memref<1x32xf32, #tpu.memory_space<vmem>>, vector<1x32xf32>
    %c0_16 = arith.constant 0 : index
    %c0_17 = arith.constant 0 : index
    %22 = vector.load %arg7[%c0_16, %c0_17] : memref<1x1xf32, #tpu.memory_space<vmem>>, vector<1x1xf32>
    %cst_18 = arith.constant dense<0.000000e+00> : vector<1x128xf32>
    %23 = tpu.matmul %21, %20, %cst_18 {dimension_numbers = #tpu.dot_dimension_numbers<[1], [0], [0], [1], [0, 0, 1, 1], [], []>} : vector<1x32xf32>, vector<32x128xf32>, vector<1x128xf32> -> vector<1x128xf32>
    %24 = vector.broadcast %22 : vector<1x1xf32> to vector<1x128xf32>
    %25 = arith.addf %23, %24 : vector<1x128xf32>
    %cst_19 = arith.constant 2.000000e+01 : f32
    %26 = vector.broadcast %cst_19 : f32 to vector<1x128xf32>
    %27 = arith.cmpf ogt, %25, %26 : vector<1x128xf32>
    %cst_20 = arith.constant 2.000000e+01 : f32
    %28 = vector.broadcast %cst_20 : f32 to vector<1x128xf32>
    %29 = arith.minimumf %25, %28 : vector<1x128xf32>
    %30 = math.exp %29 : vector<1x128xf32>
    %31 = math.log1p %30 : vector<1x128xf32>
    %32 = arith.select %27, %25, %31 : vector<1x128xi1>, vector<1x128xf32>
    %c128_i32 = arith.constant 128 : i32
    %33 = arith.muli %arg0, %c128_i32 : i32
    %34 = tpu.iota {dimensions = array<i32: 1>} : vector<1x128xi32>
    %35 = vector.broadcast %33 : i32 to vector<1x128xi32>
    %36 = arith.addi %35, %34 : vector<1x128xi32>
    %c8_i32 = arith.constant 8 : i32
    %37 = vector.broadcast %c8_i32 : i32 to vector<1x128xi32>
    %38 = arith.cmpi slt, %36, %37 : vector<1x128xi32>
    %cst_21 = arith.constant 0.000000e+00 : f32
    %39 = vector.broadcast %cst_21 : f32 to vector<1x128xf32>
    %40 = arith.select %38, %32, %39 : vector<1x128xi1>, vector<1x128xf32>
    %c0_22 = arith.constant 0 : index
    %c0_23 = arith.constant 0 : index
    %41 = vector.load %arg8[%c0_22, %c0_23] : memref<1x128xf32, #tpu.memory_space<vmem>>, vector<1x128xf32>
    tpu.vector_store %arg8[%c0_22, %c0_23], %40 {strides = array<i32>} : memref<1x128xf32, #tpu.memory_space<vmem>>, vector<1x128xf32>,
    return
  }
  func.func @transform_0(%arg0: i32) -> (i32, i32) {
    %c0_i32 = arith.constant 0 : i32
    %c0_i32_0 = arith.constant 0 : i32
    return %arg0, %c0_i32 : i32, i32
  }
  func.func @transform_1(%arg0: i32) -> (i32, i32) {
    %c0_i32 = arith.constant 0 : i32
    %c0_i32_0 = arith.constant 0 : i32
    %c0_i32_1 = arith.constant 0 : i32
    return %c0_i32, %c0_i32_0 : i32, i32
  }
  func.func @transform_2(%arg0: i32) -> (i32, i32) {
    %c0_i32 = arith.constant 0 : i32
    %c0_i32_0 = arith.constant 0 : i32
    %c0_i32_1 = arith.constant 0 : i32
    return %c0_i32, %c0_i32_0 : i32, i32
  }
  func.func @transform_3(%arg0: i32) -> (i32, i32) {
    %c0_i32 = arith.constant 0 : i32
    %c0_i32_0 = arith.constant 0 : i32
    %c0_i32_1 = arith.constant 0 : i32
    return %c0_i32, %c0_i32_0 : i32, i32
  }
  func.func @transform_4(%arg0: i32) -> (i32, i32) {
    %c0_i32 = arith.constant 0 : i32
    %c0_i32_0 = arith.constant 0 : i32
    %c0_i32_1 = arith.constant 0 : i32
    return %c0_i32, %c0_i32_0 : i32, i32
  }
  func.func @transform_5(%arg0: i32) -> (i32, i32) {
    %c0_i32 = arith.constant 0 : i32
    %c0_i32_0 = arith.constant 0 : i32
    %c0_i32_1 = arith.constant 0 : i32
    return %c0_i32, %c0_i32_0 : i32, i32
  }
  func.func @transform_6(%arg0: i32) -> (i32, i32) {
    %c0_i32 = arith.constant 0 : i32
    %c0_i32_0 = arith.constant 0 : i32
    %c0_i32_1 = arith.constant 0 : i32
    return %c0_i32, %c0_i32_0 : i32, i32
  }
  func.func @transform_7(%arg0: i32) -> (i32, i32) {
    %c0_i32 = arith.constant 0 : i32
    %c0_i32_0 = arith.constant 0 : i32
    return %c0_i32, %arg0 : i32, i32
  }
}

</mosaic_0001>

<bundles_post_ra>
// kernel: tpu_custom_call.1
= control target key start
LH: loop header
LB: loop body
LE: loop exit
PB: predicated region body
PF: predicated region fallthrough
CT: control target
= control target key end

     0   :  { %s913_s0 = inlined_call_operand.vmem [shape: f32[8,6], index: 0, kind: input, shape index: {}]   ;;  %s914_s1 = inlined_call_operand.vmem [shape: f32[32,6], index: 1, kind: input, shape index: {}]   ;;  %s915_s2 = inlined_call_operand.vmem [shape: f32[32,1], index: 2, kind: input, shape index: {}]   ;;  %s916_s3 = inlined_call_operand.vmem [shape: f32[32,32], index: 3, kind: input, shape index: {}]   ;;  %s917_s4 = inlined_call_operand.vmem [shape: f32[32,1], index: 4, kind: input, shape index: {}]   ;;  %s918_s5 = inlined_call_operand.vmem [shape: f32[1,32], index: 5, kind: input, shape index: {}]   ;;  %s919_s6 = inlined_call_operand.<no memory space> [shape: f32[1,1], index: 6, kind: input, shape index: {}]   ;;  %s920_s7 = inlined_call_operand.hbm [shape: f32[1,8], index: 7, kind: output, shape index: {}]  }
   0x1   :  { %v12_v0 = vstv %s919_s6 }
   0x2   :  { %13 = vst [vmem:[#allocation2] sm:$0x1] %v12_v0 }
   0x3   :  { %v29_v1 = vld [vmem:[%s913_s0] sm:$0xff]  ;;  %v30_v2 = vld [vmem:[%s913_s0 + $0x8] sm:$0xff]  ;;  %vm73_vm0 = vcmask 48128   ;;  %v31_v3 = vld [vmem:[%s913_s0 + $0x10] sm:$0xff]  ;;  %v707_v7 = vmov 0  }
   0x4   :  { %v610_v4 = vpack.c.bf16 %v30_v2, %v29_v1  ;;  %vm766_vm1 = vmpackc.low %vm73_vm0, %vm73_vm0  ;;  %v32_v6 = vld [vmem:[%s913_s0 + $0x18] sm:$0xff]  ;;  %677 = vset.pattern.permute.xlu0 %v707_v7  ;;  %678 = vset.pattern.permute.xlu1 %v707_v7  ;;  %v45_v9 = vld [vmem:[%s914_s1] sm:$0xff] }
   0x5   :  { %v616_v8 = vpack.c.bf16 %v32_v6, %v31_v3  ;;  %v33_v10 = vld [vmem:[%s913_s0 + $0x20] sm:$0xff]  ;;  %v34_v11 = vld [vmem:[%s913_s0 + $0x28] sm:$0xff]  ;;  %579 = vmatprep.mubr.msk.f32.mxu0 %vm73_vm0, %v45_v9  ;;  %v51_v13 = vld [vmem:[%s915_s2 + $0x10] sm:$0xff] }
   0x6   :  { %612 = vmatprep.subr.msk.bf16.mxu0 %vm766_vm1, %v610_v4  ;;  %v49_v12 = vld [vmem:[%s915_s2] sm:$0xff]  ;;  %65 = vperm.xlu1 %678, %v51_v13   ;;  %v622_v14 = vpack.c.bf16 %v34_v11, %v33_v10  ;;  %v50_v15 = vld [vmem:[%s915_s2 + $0x8] sm:$0xff]  ;;  %v52_v16 = vld [vmem:[%s915_s2 + $0x18] sm:$0xff] }
   0x7   :  { %615 = vmatpush3.bf16.xpose.msk.msra.mxu0 %vm766_vm1, %v610_v4  ;;  %55 = vperm.xlu0 %677, %v49_v12  }
   0x8   :  { %618 = vmatprep.subr.msk.bf16.mxu0 %vm766_vm1, %v616_v8 }
   0x9   :  { %14 = vsyncpa [#allocation4], 0  ;;  %v235_v17 = vld [vmem:[%s917_s4] sm:$0xff]  ;;  %v35_v18 = vld [vmem:[%s913_s0 + $0x30] sm:$0xff]  ;;  %vm259_vm2 = vcmask 261120   ;;  %v708_v2 = vmov 0.0|0.0  }
   0xa   :  { %70 = vperm.xlu1 %678, %v52_v16   ;;  %v36_v19 = vld [vmem:[%s913_s0 + $0x38] sm:$0xff]  ;;  %v236_v20 = vld [vmem:[%s917_s4 + $0x8] sm:$0xff]  ;;  %v237_v22 = vld [vmem:[%s917_s4 + $0x10] sm:$0xff]  ;;  %vm709_vm7 = vmmov 0   ;;  %v710_v3 = vmov 0.0  }
   0xb   :  { %60 = vperm.xlu0 %677, %v50_v15   ;;  %v628_v21 = vpack.c.bf16 %v36_v19, %v35_v18  ;;  %v238_v23 = vld [vmem:[%s917_s4 + $0x18] sm:$0xff]  ;;  %v370_v24 = vld [vmem:[#allocation2] sm:$0x1]  ;;  %v38_v26 = vld [vmem:[%s913_s0 + $0x48] sm:$0xff] }
   0xc   :  { %v37_v25 = vld [vmem:[%s913_s0 + $0x40] sm:$0xff]  ;;  %v39_v28 = vld [vmem:[%s913_s0 + $0x50] sm:$0xff]  ;;  %v40_v29 = vld [vmem:[%s913_s0 + $0x58] sm:$0xff] }
   0xd   :  { %v634_v27 = vpack.c.bf16 %v38_v26, %v37_v25  ;;  %v640_v30 = vpack.c.bf16 %v40_v29, %v39_v28  ;;  %v41_v31 = vld [vmem:[%s913_s0 + $0x60] sm:$0xff]  ;;  %v42_v32 = vld [vmem:[%s913_s0 + $0x68] sm:$0xff]  ;;  %v43_v34 = vld [vmem:[%s913_s0 + $0x70] sm:$0xff] }
   0xe   :  { %246 = vperm.xlu1 %678, %v236_v20   ;;  %v646_v33 = vpack.c.bf16 %v42_v32, %v41_v31  ;;  %v44_v35 = vld [vmem:[%s913_s0 + $0x78] sm:$0xff]  ;;  %v46_v37 = vld [vmem:[%s914_s1 + $0x8] sm:$0xff]  ;;  %v47_v38 = vld [vmem:[%s914_s1 + $0x10] sm:$0xff] }
   0xf   :  { %621 = vmatpush3.bf16.xpose.msk.msra.mxu0 %vm766_vm1, %v616_v8  ;;  %241 = vperm.xlu0 %677, %v235_v17   ;;  %v652_v36 = vpack.c.bf16 %v44_v35, %v43_v34  ;;  %v48_v39 = vld [vmem:[%s914_s1 + $0x18] sm:$0xff]  ;;  %v231_v40 = vld [vmem:[%s916_s3] sm:$0xff]  ;;  %v232_v63 = vld [vmem:[%s916_s3 + $0x8] sm:$0xff] }
  0x10   :  { %624 = vmatprep.subr.msk.bf16.mxu0 %vm766_vm1, %v622_v14  ;;  %593 = vmatprep.mubr.msk.f32.mxu1 %vm259_vm2, %v231_v40  ;;  %v233_v0 = vld [vmem:[%s916_s3 + $0x10] sm:$0xff]  ;;  %v234_v1 = vld [vmem:[%s916_s3 + $0x18] sm:$0xff]  ;;  %v369_v26 = vld [vmem:[%s918_s5] sm:$0x1]  ;;  %s711_s5 = smov [#allocation3]  }
  0x11   :  { %s481_s14 = sshll.u32 %s711_s5, 4  ;;  %s482_s14 = int_to_ptr.vmem [resolvable:$true] %s481_s14 }
  0x12   :  { %256 = vperm.xlu1 %678, %v238_v23   ;;  %s683_s4 = scalar_lea.vmem %s482_s14, 16  ;;  %s687_s15 = scalar_lea.vmem %s482_s14, 32 }
  0x13   :  { %251 = vperm.xlu0 %677, %v237_v22   ;;  %p684_p0 = scmp.ne.s32.totalorder %s482_s14, %s683_s4  ;;  %p688_p1 = scmp.lt.s32.totalorder %s482_s14, %s482_s14 }
  0x14   :  { %p689_p2 = scmp.lt.s32.totalorder %s687_s15, %s683_s4 }
  0x16   :  { %p690_p3 = por %p689_p2, %p688_p1 }
  0x17   :  { %627 = vmatpush3.bf16.xpose.msk.msra.mxu0 %vm766_vm1, %v622_v14  ;;  %373 = vperm.xlu0 %677, %v370_v24  }
  0x18   :  { %630 = vmatprep.subr.msk.bf16.mxu0 %vm766_vm1, %v628_v21  ;;  %p691_p4 = pnand %p690_p3, %p684_p0 }
  0x1f   :  { %633 = vmatpush3.bf16.xpose.msk.msra.mxu0 %vm766_vm1, %v628_v21 }
  0x20   :  { %636 = vmatprep.subr.msk.bf16.mxu0 %vm766_vm1, %v634_v27 }
  0x27   :  { %639 = vmatpush3.bf16.xpose.msk.msra.mxu0 %vm766_vm1, %v634_v27  ;;  %v376_v27 = vlaneseq }
  0x28   :  { %642 = vmatprep.subr.msk.bf16.mxu0 %vm766_vm1, %v640_v30 }
  0x29   :  { %v377_v28 = vshrl.u32 %v376_v27, 7 }
  0x2b   :  { %v378_v29 = vsub.s32 0, %v377_v28 }
  0x2f   :  { %645 = vmatpush3.bf16.xpose.msk.msra.mxu0 %vm766_vm1, %v640_v30 }
  0x30   :  { %648 = vmatprep.subr.msk.bf16.mxu0 %vm766_vm1, %v646_v33 }
  0x37   :  { %651 = vmatpush3.bf16.xpose.msk.msra.mxu0 %vm766_vm1, %v646_v33 }
  0x38   :  { %654 = vmatprep.subr.msk.bf16.mxu0 %vm766_vm1, %v652_v36 }
  0x3f   :  { %657 = vmatpush3.bf16.xpose.msk.msra.mxu0 %vm766_vm1, %v652_v36 }
  0x46   :  { %580 = vmatmul.mubr.msk.f32.vlgmr.msra.gmra.mrb[0].mxu0 %vm73_vm0, %v46_v37 }
  0x47   :  { %582 = vmatprep.mubr.msk.f32.mxu0 %vm73_vm0, %v47_v38 }
  0x4a   :  { %583 = vmatmul.mubr.msk.f32.gmra.mrb[2].mxu0 %vm73_vm0, %v48_v39 }
  0x85   :  { %v66_v42 = vpop.permute.xlu1 %65 }
  0x86   :  { %v56_v41 = vpop.permute.xlu0 %55 }
  0x89   :  { %v71_v49 = vpop.permute.xlu1 %70 }
  0x8a   :  { %v61_v43 = vpop.permute.xlu0 %60 }
  0x8d   :  { %v247_v4 = vpop.permute.xlu1 %246 }
  0x8e   :  { %v242_v5 = vpop.permute.xlu0 %241 }
  0x91   :  { %v257_v11 = vpop.permute.xlu1 %256 }
  0x92   :  { %v252_v14 = vpop.permute.xlu0 %251 }
  0x96   :  { %v374_v30 = vpop.permute.xlu0 %373 }
  0x97   :  { %v379_v31 = vrot.slane %v374_v30, %v378_v29 }
 0x119   :  { %v581_v44 = vpop.f32.mrb[0].mxu0 }
 0x11a   :  { %v206_v45 = vadd.f32 %v581_v44, %v61_v43  ;;  %v200_v46 = vpop.f32.mrb[1].mxu0 }
 0x11b   :  { %v201_v47 = vadd.f32 %v200_v46, %v56_v41 }
 0x11c   :  { %v224_v48 = vmul.f32 0.01, %v206_v45  ;;  %vm220_vm3 = vcmp.ge.f32.partialorder %v206_v45, 0.0 }
 0x11d   :  { %v223_v50 = vmul.f32 0.01, %v201_v47  ;;  %v584_v51 = vpop.f32.mrb[2].mxu0  ;;  %vm219_vm4 = vcmp.ge.f32.partialorder %v201_v47, 0.0 }
 0x11e   :  { %v216_v52 = vadd.f32 %v584_v51, %v71_v49  ;;  %v210_v53 = vpop.f32.mrb[3].mxu0  ;;  %v228_v54 = vsel %vm220_vm3, %v206_v45, %v224_v48 }
 0x11f   :  { %v211_v55 = vadd.f32 %v210_v53, %v66_v42  ;;  %v227_v56 = vsel %vm219_vm4, %v201_v47, %v223_v50  ;;  %v469_v42 = vand.u32 127, %v376_v27 }
 0x120   :  { %vm222_vm5 = vcmp.ge.f32.partialorder %v216_v52, 0.0  ;;  %v226_v57 = vmul.f32 0.01, %v216_v52  ;;  %v658_v58 = vpack.c.bf16 %v228_v54, %v227_v56 }
 0x121   :  { %vm221_vm6 = vcmp.ge.f32.partialorder %v211_v55, 0.0  ;;  %v225_v59 = vmul.f32 0.01, %v211_v55  ;;  %vm472_vm13 = vcmp.lt.s32.totalorder %v469_v42, 8 }
 0x122   :  { %659 = vmatprep.subr.bf16.mxu1 %v658_v58  ;;  %v230_v60 = vsel %vm222_vm5, %v216_v52, %v226_v57 }
 0x123   :  { %661 = vmatpush3.bf16.msra.mxu1 %v658_v58  ;;  %v229_v61 = vsel %vm221_vm6, %v211_v55, %v225_v59 }
 0x124   :  { %v662_v62 = vpack.c.bf16 %v230_v60, %v229_v61 }
 0x126   :  { %663 = vmatprep.subr.bf16.mxu1 %v662_v62 }
 0x127   :  { %665 = vmatpush3.bf16.msra.mxu1 %v662_v62 }
 0x128   :  { %666 = vmatprep.subr.bf16.mxu1 %v708_v2 }
 0x12a   :  { %594 = vmatmul.mubr.msk.f32.vlgmr.msra.gmra.mrb[0].mxu1 %vm259_vm2, %v232_v63 }
 0x12b   :  { %596 = vmatprep.mubr.msk.f32.mxu1 %vm259_vm2, %v233_v0 }
 0x12e   :  { %597 = vmatmul.mubr.msk.f32.gmra.mrb[2].mxu1 %vm259_vm2, %v234_v1 }
 0x12f   :  { %607 = vmatprep.mubr.msk.f32.mxu1 %vm709_vm7, %v710_v3 }
 0x1fd   :  { %v595_v6 = vpop.f32.mrb[0].mxu1 }
 0x1fe   :  { %v344_v7 = vadd.f32 %v595_v6, %v247_v4  ;;  %v338_v8 = vpop.f32.mrb[1].mxu1 }
 0x1ff   :  { %v339_v9 = vadd.f32 %v338_v8, %v242_v5 }
 0x200   :  { %vm358_vm8 = vcmp.ge.f32.partialorder %v344_v7, 0.0  ;;  %v362_v10 = vmul.f32 0.01, %v344_v7 }
 0x201   :  { %vm357_vm9 = vcmp.ge.f32.partialorder %v339_v9, 0.0  ;;  %v361_v12 = vmul.f32 0.01, %v339_v9  ;;  %v598_v13 = vpop.f32.mrb[2].mxu1 }
 0x202   :  { %v366_v15 = vsel %vm358_vm8, %v344_v7, %v362_v10  ;;  %v354_v16 = vadd.f32 %v598_v13, %v257_v11  ;;  %v348_v17 = vpop.f32.mrb[3].mxu1 }
 0x203   :  { %v365_v18 = vsel %vm357_vm9, %v339_v9, %v361_v12  ;;  %v349_v19 = vadd.f32 %v348_v17, %v252_v14 }
 0x204   :  { %v667_v20 = vpack.c.bf16 %v366_v15, %v365_v18  ;;  %vm360_vm10 = vcmp.ge.f32.partialorder %v354_v16, 0.0  ;;  %v364_v21 = vmul.f32 0.01, %v354_v16 }
 0x205   :  { %vm359_vm11 = vcmp.ge.f32.partialorder %v349_v19, 0.0  ;;  %v363_v22 = vmul.f32 0.01, %v349_v19 }
 0x206   :  { %v368_v23 = vsel %vm360_vm10, %v354_v16, %v364_v21  ;;  %668 = vmatpush3.bf16.msra.mxu1 %v667_v20 }
 0x207   :  { %v367_v24 = vsel %vm359_vm11, %v349_v19, %v363_v22  ;;  %669 = vmatprep.subr.bf16.mxu1 %v708_v2 }
 0x208   :  { %v670_v25 = vpack.c.bf16 %v368_v23, %v367_v24 }
 0x20a   :  { %671 = vmatpush3.bf16.msra.mxu1 %v670_v25 }
 0x20d   :  { %608 = vmatmul.mubr.msk.f32.vlgmr.msra.gmra.mrb[4].mxu1 %vm259_vm2, %v369_v26 }
 0x2e0   :  { %v449_v32 = vpop.f32.mrb[4].mxu1 }
 0x2e1   :  { %v450_v33 = vadd.f32 %v449_v32, %v379_v31  ;;  %v609_v34 = vpop.f32.mrb[5].mxu1 }
 0x2e3   :  { %v454_v35 = vmin.f32 %v450_v33, 20.0  ;;  %vm453_vm14 = vcmp.gt.f32.partialorder %v450_v33, 20.0 }
 0x2e5   :  { %v455_v36 = vmul.f32 1.442695, %v454_v35 }
 0x2e7   :  { %679 = vpow2.f32 %v455_v36 }
 0x2f1   :  { %v680_v37 = vpop.eup %679 }
 0x2f2   :  { %v457_v38 = vadd.f32 1.0, %v680_v37  ;;  %v460_v39 = vmul.f32 -0.5, %v680_v37  ;;  %v463_v41 = vand.u32 2147483647, %v680_v37 }
 0x2f4   :  { %681 = vlog2.f32 %v457_v38  ;;  %v461_v40 = vadd.f32 1.0, %v460_v39  ;;  %vm464_vm12 = vcmp.lt.f32.partialorder %v463_v41, 0.0004427343 }
 0x2f6   :  { %v462_v45 = vmul.f32 %v680_v37, %v461_v40 }
 0x2fe   :  { %v682_v43 = vpop.eup %681 }
 0x2ff   :  { %v459_v44 = vmul.f32 0.6931472, %v682_v43 }
 0x301   :  { %v465_v46 = vsel %vm464_vm12, %v462_v45, %v459_v44 }
 0x302   :  { %v466_v47 = vsel %vm453_vm14, %v450_v33, %v465_v46 }
 0x303   :  { %v473_v48 = vsel %vm472_vm13, %v466_v47, 0.0 }
 0x304   :  { %474 = vst [vmem:[#allocation3] sm:$0x1] %v473_v48 }
 0x305   :  { %694 = shalt.err (!%p691_p4)
}
 0x306   :  { %s695_s18 = scalar_lea.hbm %s920_s7, 16 }
 0x307   :  { %p696_p5 = scmp.ne.s32.totalorder %s920_s7, %s695_s18  ;;  %p699_p6 = scmp.lt.u32.totalorder %s695_s18, %s920_s7 }
 0x309   :  { %p701_p7 = pnand %p699_p6, %p696_p5 }
 0x30b   :  { %704 = shalt.err (!%p701_p7)
}
 0x30c   :  { %484 = dma.vmem_to_hbm [thread:$0]  %s482_s14, 16, %s920_s7, [#allocation4]  }
 0x30d   :  { %705 = dma.done.wait [#allocation4], 16  }
 0x30e   :  { %706 = vsyncadd [#allocation4], 4294967280 }
 0x30f   :  { %488 = vsyncpa [#allocation4], 1 }

</bundles_post_ra>
